<compile_context>
chip_gen: v5e
topology: v5e:2x2
jax: 0.10.0
libtpu: 0.0.40
codegen_flags: <defaults>
</compile_context>

<pallas_src>
import jax
import jax.numpy as jnp
from jax.experimental import pallas as pl
from jax.experimental.pallas import tpu as pltpu


def predictor_kernel(x_ref, h_ref, w1x_ref, w1h_ref, w2_ref, b2_ref, o_ref):
    """One batch block.

    x_ref   : (bn, Dx) bf16   x_in tile
    h_ref   : (bn, Dh) bf16   ht tile
    w1x_ref : (Dx, H)  bf16   first-layer weight rows for x_in (resident)
    w1h_ref : (Dh, H)  bf16   first-layer weight rows for ht   (resident)
    w2_ref  : (1, H)   f32    second-layer weight row (resident)
    b2_ref  : (1, 1)   f32    second-layer bias (SMEM scalar)
    o_ref   : (bn, 1)  f32    output tile
    """
    # Layer 1 (bias-free) on the implicit concat [x, h]: two MXU matmuls that
    # accumulate in f32 — no in-kernel concatenation, no wrapper concat pass.
    z = jnp.dot(x_ref[...], w1x_ref[...], preferred_element_type=jnp.float32)
    z = z + jnp.dot(h_ref[...], w1h_ref[...], preferred_element_type=jnp.float32)
    # Sigmoid via a single EUP transcendental: sigmoid(z) = 0.5*tanh(0.5*z)+0.5.
    s = 0.5 * jnp.tanh(0.5 * z) + 0.5
    # Layer 2 (H -> 1): VPU multiply + cross-lane (XLU) reduction; bias is a
    # free SMEM scalar read. Avoids a serial N=1 MXU push/pop.
    y = jnp.sum(s * w2_ref[...], axis=-1, keepdims=True) + b2_ref[0, 0]
    o_ref[...] = y.astype(o_ref.dtype)  # (bn, 1)


def _cdiv(a, b):
    return -(-a // b)


def _plan_batch(B, vmem_budget_bytes=20 * 1024 * 1024):
    """Pick (B_pad, bn): batch zero-padded to a multiple of the block size bn.

    VMEM bytes per batch row held by the pipeline (lanes pad to 128):
      2 bf16 input tiles, double-buffered   : 2 * 2 * 128 * 2 = 1024 B
      1 f32 output tile,  double-buffered   : 2 * 128 * 4     = 1024 B
      ~2 lane-padded f32 intermediates (z,s): 2 * 128 * 4     = 1024 B
    => ~3 KiB/row.  A ~20 MiB budget gives bn ~ 6.5K rows, well past the point
    where the ~0.35 us per-grid-step overhead is amortized, and safely inside
    v7x's 32 MiB scoped / 64 MiB physical VMEM.
    """
    align = 256                       # keeps sublane dim aligned, stores unmasked
    per_row = 3072
    bn_cap = max(align, (vmem_budget_bytes // per_row) // align * align)
    b_pad = _cdiv(B, align) * align
    if b_pad > bn_cap:
        bn = bn_cap
    elif b_pad >= 2 * align:
        # Split into ~two blocks: both v7x TensorCores get work under
        # dimension_semantics=("parallel",) and the DMA pipeline overlaps.
        bn = _cdiv(b_pad // align, 2) * align
    else:
        bn = b_pad                    # tiny batch: one small block
    b_pad = _cdiv(b_pad, bn) * bn
    return b_pad, bn


def predictor_forward(x_in, ht, w1, w2, b2):
    """sigmoid(cat([x_in, ht], -1) @ w1) @ w2 + b2  ->  (B, 1).

    x_in: (B, Dx), ht: (B, Dh), w1: (Dx+Dh, H), w2: (H, 1) or (H,), b2: (1,1)|(1,).
    """
    B, Dx = x_in.shape
    Bh, Dh = ht.shape
    assert B == Bh
    D = Dx + Dh
    assert w1.shape[0] == D
    H = w1.shape[1]

    # TODO(synk): in the real ODE model, store W1 in bf16 (and pre-split) at
    # init and have the producing cell emit bf16 activations directly so these
    # casts / the zero-padding fuse into the producer instead of costing an
    # extra HBM pass here.
    w1x = w1[:Dx].astype(jnp.bfloat16)                   # (Dx, H) resident
    w1h = w1[Dx:].astype(jnp.bfloat16)                   # (Dh, H) resident
    w2_row = jnp.reshape(w2, (1, H)).astype(jnp.float32)  # (1, H)
    b2_s = jnp.asarray(b2, jnp.float32).reshape(1, 1)     # SMEM scalar

    B_pad, bn = _plan_batch(B)
    x_p = x_in.astype(jnp.bfloat16)
    h_p = ht.astype(jnp.bfloat16)
    if B_pad != B:
        x_p = jnp.pad(x_p, ((0, B_pad - B), (0, 0)))
        h_p = jnp.pad(h_p, ((0, B_pad - B), (0, 0)))

    grid = (B_pad // bn,)

    cost = pl.CostEstimate(
        flops=2 * B_pad * D * H + 3 * B_pad * H,
        transcendentals=B_pad * H,                        # one tanh per hidden unit
        bytes_accessed=2 * B_pad * D + 2 * D * H + 4 * H + 4 + 4 * B_pad,
    )

    out_p = pl.pallas_call(
        predictor_kernel,
        out_shape=jax.ShapeDtypeStruct((B_pad, 1), jnp.float32),
        grid=grid,
        in_specs=[
            pl.BlockSpec((bn, Dx), lambda i: (i, 0)),            # x_in tile
            pl.BlockSpec((bn, Dh), lambda i: (i, 0)),            # ht tile
            pl.BlockSpec((Dx, H), lambda i: (0, 0)),             # W1[:Dx] resident
            pl.BlockSpec((Dh, H), lambda i: (0, 0)),             # W1[Dx:] resident
            pl.BlockSpec((1, H), lambda i: (0, 0)),              # w2 row resident
            pl.BlockSpec(memory_space=pltpu.MemorySpace.SMEM),   # b2 scalar
        ],
        out_specs=pl.BlockSpec((bn, 1), lambda i: (i, 0)),
        compiler_params=pltpu.CompilerParams(
            dimension_semantics=("parallel",),         # megacore / v7x 2-TC sharding
            vmem_limit_bytes=32 * 1024 * 1024,         # headroom over the ~20 MiB plan
        ),
        cost_estimate=cost,
    )(x_p, h_p, w1x, w1h, w2_row, b2_s)

    # TODO(synk): when driven inside the ODE recurrence, fuse the timestep loop
    # into this kernel (grid axis over T marked "arbitrary", ht kept in VMEM
    # scratch, weights resident) instead of one pallas_call per step — that is
    # where the real end-to-end win is.
    return out_p[:B]


def predictor_ref(x_in, ht, w1, w2, b2):
    x = jnp.concatenate([x_in, ht], axis=-1)
    return jax.nn.sigmoid(x @ w1) @ jnp.reshape(w2, (w1.shape[1], 1)) + jnp.reshape(
        jnp.asarray(b2), (1, 1)
    )


if __name__ == "__main__":
    key = jax.random.PRNGKey(0)
    k_x, k_h, k_w1, k_w2, k_b2 = jax.random.split(key, 5)

    # Small shapes consistent with the module: x_in (B, Dx), ht (B, Dh),
    # input_size = Dx + Dh, hidden = H, output (B, 1).
    B, Dx, Dh, H = 8, 24, 8, 32
    input_size = Dx + Dh

    x_in = jax.random.normal(k_x, (B, Dx), dtype=jnp.float32)
    ht = jax.random.normal(k_h, (B, Dh), dtype=jnp.float32)

    # Deterministic parameter init (uniform, like PyTorch's default scale).
    lim1 = 1.0 / jnp.sqrt(input_size)
    lim2 = 1.0 / jnp.sqrt(H)
    w1 = jax.random.uniform(k_w1, (input_size, H), jnp.float32, -lim1, lim1)
    w2 = jax.random.uniform(k_w2, (H, 1), jnp.float32, -lim2, lim2)
    b2 = jax.random.uniform(k_b2, (1, 1), jnp.float32, -lim2, lim2)

    fwd = jax.jit(predictor_forward)
    out = jax.block_until_ready(fwd(x_in, ht, w1, w2, b2))

    ref = predictor_ref(x_in, ht, w1, w2, b2)
    assert out.shape == (B, 1)
    # bf16 activations / W1 on the MXU: relaxed tolerance vs the f32 reference.
    assert jnp.allclose(out, ref, atol=2e-2, rtol=2e-2), "mismatch vs reference"

    print("KERNEL_OK")
</pallas_src>

<mosaic_0001>
module attributes {stable_mosaic.version = 11 : i64} {
  func.func @predictor_kernel(%arg0: i32, %arg1: memref<256x24xbf16, #tpu.memory_space<vmem>>, %arg2: memref<256x8xbf16, #tpu.memory_space<vmem>>, %arg3: memref<24x32xbf16, #tpu.memory_space<vmem>>, %arg4: memref<8x32xbf16, #tpu.memory_space<vmem>>, %arg5: memref<1x32xf32, #tpu.memory_space<vmem>>, %arg6: memref<1x1xf32, #tpu.memory_space<smem>>, %arg7: memref<256x1xf32, #tpu.memory_space<vmem>>) attributes {dimension_semantics = [#tpu.dimension_semantics<parallel>], iteration_bounds = array<i64: 1>, scalar_prefetch = 0 : i64, scratch_operands = 0 : i64, tpu.core_type = #tpu.core_type<tc>, window_params = [{transform_indices = @transform_0, window_bounds = array<i64: 256, 24>}, {transform_indices = @transform_1, window_bounds = array<i64: 256, 8>}, {pipeline_mode = #tpu.pipeline_mode<synchronous>, transform_indices = @transform_2, window_bounds = array<i64: 24, 32>}, {pipeline_mode = #tpu.pipeline_mode<synchronous>, transform_indices = @transform_3, window_bounds = array<i64: 8, 32>}, {pipeline_mode = #tpu.pipeline_mode<synchronous>, transform_indices = @transform_4, window_bounds = array<i64: 1, 32>}, {transform_indices = @transform_5, window_bounds = array<i64: 1, 1>}, {transform_indices = @transform_6, window_bounds = array<i64: 256, 1>}]} {
    %c0 = arith.constant 0 : index
    %c0_0 = arith.constant 0 : index
    %0 = vector.load %arg1[%c0, %c0_0] : memref<256x24xbf16, #tpu.memory_space<vmem>>, vector<256x24xbf16>
    %c0_1 = arith.constant 0 : index
    %c0_2 = arith.constant 0 : index
    %1 = vector.load %arg3[%c0_1, %c0_2] : memref<24x32xbf16, #tpu.memory_space<vmem>>, vector<24x32xbf16>
    %cst = arith.constant dense<0.000000e+00> : vector<256x32xf32>
    %2 = tpu.matmul %0, %1, %cst {dimension_numbers = #tpu.dot_dimension_numbers<[1], [0], [0], [1], [0, 0, 1, 1], [], []>} : vector<256x24xbf16>, vector<24x32xbf16>, vector<256x32xf32> -> vector<256x32xf32>
    %c0_3 = arith.constant 0 : index
    %c0_4 = arith.constant 0 : index
    %3 = vector.load %arg2[%c0_3, %c0_4] : memref<256x8xbf16, #tpu.memory_space<vmem>>, vector<256x8xbf16>
    %c0_5 = arith.constant 0 : index
    %c0_6 = arith.constant 0 : index
    %4 = vector.load %arg4[%c0_5, %c0_6] : memref<8x32xbf16, #tpu.memory_space<vmem>>, vector<8x32xbf16>
    %cst_7 = arith.constant dense<0.000000e+00> : vector<256x32xf32>
    %5 = tpu.matmul %3, %4, %cst_7 {dimension_numbers = #tpu.dot_dimension_numbers<[1], [0], [0], [1], [0, 0, 1, 1], [], []>} : vector<256x8xbf16>, vector<8x32xbf16>, vector<256x32xf32> -> vector<256x32xf32>
    %6 = arith.addf %2, %5 : vector<256x32xf32>
    %cst_8 = arith.constant 5.000000e-01 : f32
    %7 = vector.broadcast %cst_8 : f32 to vector<256x32xf32>
    %8 = arith.mulf %7, %6 : vector<256x32xf32>
    %9 = math.tanh %8 : vector<256x32xf32>
    %cst_9 = arith.constant 5.000000e-01 : f32
    %10 = vector.broadcast %cst_9 : f32 to vector<256x32xf32>
    %11 = arith.mulf %10, %9 : vector<256x32xf32>
    %cst_10 = arith.constant 5.000000e-01 : f32
    %12 = vector.broadcast %cst_10 : f32 to vector<256x32xf32>
    %13 = arith.addf %11, %12 : vector<256x32xf32>
    %c0_11 = arith.constant 0 : index
    %c0_12 = arith.constant 0 : index
    %14 = vector.load %arg5[%c0_11, %c0_12] : memref<1x32xf32, #tpu.memory_space<vmem>>, vector<1x32xf32>
    %15 = vector.broadcast %14 : vector<1x32xf32> to vector<256x32xf32>
    %16 = arith.mulf %13, %15 : vector<256x32xf32>
    %cst_13 = arith.constant dense<0.000000e+00> : vector<256xf32>
    %17 = vector.multi_reduction <add>, %16, %cst_13 [1] : vector<256x32xf32> to vector<256xf32>
    %18 = vector.shape_cast %17 : vector<256xf32> to vector<256x1xf32>
    %c0_14 = arith.constant 0 : index
    %c0_15 = arith.constant 0 : index
    %19 = memref.load %arg6[%c0_14, %c0_15] : memref<1x1xf32, #tpu.memory_space<smem>>
    %20 = vector.broadcast %19 : f32 to vector<256x1xf32>
    %21 = arith.addf %18, %20 : vector<256x1xf32>
    %c0_16 = arith.constant 0 : index
    %c0_17 = arith.constant 0 : index
    %22 = vector.load %arg7[%c0_16, %c0_17] : memref<256x1xf32, #tpu.memory_space<vmem>>, vector<256x1xf32>
    tpu.vector_store %arg7[%c0_16, %c0_17], %21 {strides = array<i32>} : memref<256x1xf32, #tpu.memory_space<vmem>>, vector<256x1xf32>,
    return
  }
  func.func @transform_0(%arg0: i32) -> (i32, i32) {
    %c0_i32 = arith.constant 0 : i32
    %c0_i32_0 = arith.constant 0 : i32
    return %arg0, %c0_i32 : i32, i32
  }
  func.func @transform_1(%arg0: i32) -> (i32, i32) {
    %c0_i32 = arith.constant 0 : i32
    %c0_i32_0 = arith.constant 0 : i32
    return %arg0, %c0_i32 : i32, i32
  }
  func.func @transform_2(%arg0: i32) -> (i32, i32) {
    %c0_i32 = arith.constant 0 : i32
    %c0_i32_0 = arith.constant 0 : i32
    %c0_i32_1 = arith.constant 0 : i32
    return %c0_i32, %c0_i32_0 : i32, i32
  }
  func.func @transform_3(%arg0: i32) -> (i32, i32) {
    %c0_i32 = arith.constant 0 : i32
    %c0_i32_0 = arith.constant 0 : i32
    %c0_i32_1 = arith.constant 0 : i32
    return %c0_i32, %c0_i32_0 : i32, i32
  }
  func.func @transform_4(%arg0: i32) -> (i32, i32) {
    %c0_i32 = arith.constant 0 : i32
    %c0_i32_0 = arith.constant 0 : i32
    %c0_i32_1 = arith.constant 0 : i32
    return %c0_i32, %c0_i32_0 : i32, i32
  }
  func.func @transform_5(%arg0: i32) -> (i32, i32) {
    %c0_i32 = arith.constant 0 : i32
    %c0_i32_0 = arith.constant 0 : i32
    %c0_i32_1 = arith.constant 0 : i32
    return %c0_i32, %c0_i32_0 : i32, i32
  }
  func.func @transform_6(%arg0: i32) -> (i32, i32) {
    %c0_i32 = arith.constant 0 : i32
    %c0_i32_0 = arith.constant 0 : i32
    return %arg0, %c0_i32 : i32, i32
  }
}

</mosaic_0001>

<bundles_post_ra>
// kernel: predictor_forward.1
= control target key start
LH: loop header
LB: loop body
LE: loop exit
PB: predicated region body
PF: predicated region fallthrough
CT: control target
= control target key end

     0   :  { %vm222_vm0 = vcmask 1043456   ;;  %vm173_vm1 = vcmask 64512   ;;  %vm404_vm2 = vcmask 195584   ;;  %vm709_vm3 = vcmask 261120   ;;  %s1554_s3 = inlined_call_operand.vmem [shape: bf16[8,32], index: 3, kind: input, shape index: {}]   ;;  %s1555_s1 = inlined_call_operand.vmem [shape: bf16[256,8], index: 1, kind: input, shape index: {}]   ;;  %s1556_s2 = inlined_call_operand.vmem [shape: bf16[24,32], index: 2, kind: input, shape index: {}]   ;;  %s1557_s0 = inlined_call_operand.vmem [shape: bf16[256,24], index: 0, kind: input, shape index: {}]   ;;  %s1558_s4 = inlined_call_operand.vmem [shape: f32[1,32], index: 4, kind: input, shape index: {}]   ;;  %s1559_s5 = inlined_call_operand.<no memory space> [shape: f32[1,1], index: 5, kind: input, shape index: {}]   ;;  %s1560_s6 = inlined_call_operand.vmem [shape: f32[256,1], index: 6, kind: output, shape index: {}]  }
   0x1   :  { %v92_v0 = vld [vmem:[%s1554_s3] sm:$0xf]  ;;  %v59_v1 = vld [vmem:[%s1556_s2 + $0x8] sm:$0xf]  ;;  %v1068_v12 = vld [vmem:[%s1555_s1 + $0x50] sm:$0xff]  ;;  %vm840_vm4 = vcmask 7168  }
   0x2   :  { %v224_v2 = vsel %vm222_vm0, %v92_v0, 0  ;;  %v1058_v3 = vld [vmem:[%s1555_s1] sm:$0xff]  ;;  %v400_v4 = vunpack.c.l.b16 %v59_v1  ;;  %v1067_v5 = vld [vmem:[%s1555_s1 + $0x48] sm:$0xff]  ;;  %v1060_v15 = vld [vmem:[%s1555_s1 + $0x10] sm:$0xff] }
   0x3   :  { %233 = vmatpush.bf16.msra.mxu0 %v224_v2  ;;  %1074 = vmatpush.bf16.msra.mxu3 %v224_v2  ;;  %v1057_v8 = vld [vmem:[%s1556_s2] sm:$0xff]  ;;  %v1059_v11 = vld [vmem:[%s1555_s1 + $0x8] sm:$0xff]  ;;  %v1069_v16 = vld [vmem:[%s1555_s1 + $0x58] sm:$0xff] }
   0x4   :  { %v402_v6 = vpack.c.b16 %v400_v4, %v400_v4  ;;  %v1041_v9 = vld [vmem:[%s1557_s0] sm:$0xff]  ;;  %v1042_v13 = vld [vmem:[%s1557_s0 + $0x8] sm:$0xff]  ;;  %v1043_v17 = vld [vmem:[%s1557_s0 + $0x10] sm:$0xff] }
   0x5   :  { %v1049_v10 = vld [vmem:[%s1557_s0 + $0x40] sm:$0xff]  ;;  %v1050_v14 = vld [vmem:[%s1557_s0 + $0x48] sm:$0xff]  ;;  %v1051_v18 = vld [vmem:[%s1557_s0 + $0x50] sm:$0xff] }
   0x6   :  { %941 = vmatmul.msk.bf16.vlgmr.msra.gmra.mxu0 %vm173_vm1, %v1058_v3  ;;  %v454_v7 = vsel %vm222_vm0, %v402_v6, 0  ;;  %950 = vmatmul.msk.bf16.vlgmr.msra.gmra.mxu3 %vm173_vm1, %v1067_v5  ;;  %v1061_v19 = vld [vmem:[%s1555_s1 + $0x18] sm:$0xff]  ;;  %v1070_v20 = vld [vmem:[%s1555_s1 + $0x60] sm:$0xff]  ;;  %v1071_v24 = vld [vmem:[%s1555_s1 + $0x68] sm:$0xff] }
   0x7   :  { %462 = vmatpush.bf16.msra.mxu1 %v454_v7  ;;  %1075 = vmatpush.bf16.msra.mxu2 %v454_v7  ;;  %v1044_v21 = vld [vmem:[%s1557_s0 + $0x18] sm:$0xff]  ;;  %v1062_v23 = vld [vmem:[%s1555_s1 + $0x20] sm:$0xff]  ;;  %v1063_v27 = vld [vmem:[%s1555_s1 + $0x28] sm:$0xff] }
   0x8   :  { %v1052_v22 = vld [vmem:[%s1557_s0 + $0x58] sm:$0xff]  ;;  %v1045_v25 = vld [vmem:[%s1557_s0 + $0x20] sm:$0xff]  ;;  %v1072_v28 = vld [vmem:[%s1555_s1 + $0x70] sm:$0xff] }
   0x9   :  { %v1053_v26 = vld [vmem:[%s1557_s0 + $0x60] sm:$0xff]  ;;  %v1046_v29 = vld [vmem:[%s1557_s0 + $0x28] sm:$0xff]  ;;  %v1064_v31 = vld [vmem:[%s1555_s1 + $0x30] sm:$0xff] }
   0xa   :  { %v1054_v30 = vld [vmem:[%s1557_s0 + $0x68] sm:$0xff]  ;;  %v1073_v32 = vld [vmem:[%s1555_s1 + $0x78] sm:$0xff]  ;;  %v1047_v33 = vld [vmem:[%s1557_s0 + $0x30] sm:$0xff] }
   0xb   :  { %463 = vmatpush.bf16.msra.mxu1 %v1057_v8  ;;  %1076 = vmatpush.bf16.msra.mxu2 %v1057_v8  ;;  %v1055_v34 = vld [vmem:[%s1557_s0 + $0x70] sm:$0xff]  ;;  %v1065_v35 = vld [vmem:[%s1555_s1 + $0x38] sm:$0xff]  ;;  %v1066_v38 = vld [vmem:[%s1555_s1 + $0x40] sm:$0xff] }
   0xc   :  { %v1048_v36 = vld [vmem:[%s1557_s0 + $0x38] sm:$0xff]  ;;  %v1319_v53 = vld [vmem:[%s1558_s4] ss:$0 sm:$0xff] }
   0xd   :  { %v1056_v37 = vld [vmem:[%s1557_s0 + $0x78] sm:$0xff] }
   0xe   :  { %1025 = vmatmul.msk.bf16.vlgmr.msra.gmra.mxu1 %vm404_vm2, %v1041_v9  ;;  %1033 = vmatmul.msk.bf16.vlgmr.msra.gmra.mxu2 %vm404_vm2, %v1049_v10 }
  0x16   :  { %942 = vmatmul.msk.bf16.gmra.mxu0 %vm173_vm1, %v1059_v11  ;;  %951 = vmatmul.msk.bf16.gmra.mxu3 %vm173_vm1, %v1068_v12 }
  0x1e   :  { %1026 = vmatmul.msk.bf16.gmra.mxu1 %vm404_vm2, %v1042_v13  ;;  %1034 = vmatmul.msk.bf16.gmra.mxu2 %vm404_vm2, %v1050_v14 }
  0x26   :  { %943 = vmatmul.msk.bf16.gmra.mxu0 %vm173_vm1, %v1060_v15  ;;  %952 = vmatmul.msk.bf16.gmra.mxu3 %vm173_vm1, %v1069_v16 }
  0x2e   :  { %1027 = vmatmul.msk.bf16.gmra.mxu1 %vm404_vm2, %v1043_v17  ;;  %1035 = vmatmul.msk.bf16.gmra.mxu2 %vm404_vm2, %v1051_v18 }
  0x36   :  { %944 = vmatmul.msk.bf16.gmra.mxu0 %vm173_vm1, %v1061_v19  ;;  %953 = vmatmul.msk.bf16.gmra.mxu3 %vm173_vm1, %v1070_v20 }
  0x3e   :  { %1028 = vmatmul.msk.bf16.gmra.mxu1 %vm404_vm2, %v1044_v21  ;;  %1036 = vmatmul.msk.bf16.gmra.mxu2 %vm404_vm2, %v1052_v22 }
  0x46   :  { %945 = vmatmul.msk.bf16.gmra.mxu0 %vm173_vm1, %v1062_v23  ;;  %954 = vmatmul.msk.bf16.gmra.mxu3 %vm173_vm1, %v1071_v24 }
  0x4e   :  { %1029 = vmatmul.msk.bf16.gmra.mxu1 %vm404_vm2, %v1045_v25  ;;  %1037 = vmatmul.msk.bf16.gmra.mxu2 %vm404_vm2, %v1053_v26 }
  0x56   :  { %946 = vmatmul.msk.bf16.gmra.mxu0 %vm173_vm1, %v1063_v27  ;;  %955 = vmatmul.msk.bf16.gmra.mxu3 %vm173_vm1, %v1072_v28 }
  0x5e   :  { %1030 = vmatmul.msk.bf16.gmra.mxu1 %vm404_vm2, %v1046_v29  ;;  %1038 = vmatmul.msk.bf16.gmra.mxu2 %vm404_vm2, %v1054_v30 }
  0x66   :  { %947 = vmatmul.msk.bf16.gmra.mxu0 %vm173_vm1, %v1064_v31  ;;  %956 = vmatmul.msk.bf16.gmra.mxu3 %vm173_vm1, %v1073_v32 }
  0x6e   :  { %1031 = vmatmul.msk.bf16.gmra.mxu1 %vm404_vm2, %v1047_v33  ;;  %1039 = vmatmul.msk.bf16.gmra.mxu2 %vm404_vm2, %v1055_v34 }
  0x76   :  { %948 = vmatmul.msk.bf16.gmra.mxu0 %vm173_vm1, %v1065_v35 }
  0x7e   :  { %1032 = vmatmul.msk.bf16.gmra.mxu1 %vm404_vm2, %v1048_v36  ;;  %1040 = vmatmul.msk.bf16.gmra.mxu2 %vm404_vm2, %v1056_v37 }
  0x83   :  { %v235_v39 = vpop.f32.mrf.mxu0 }
  0x86   :  { %949 = vmatmul.msk.bf16.gmra.mxu0 %vm173_vm1, %v1066_v38 }
  0x89   :  { %v280_v40 = vpop.f32.mrf.mxu3 }
  0x8b   :  { %v237_v41 = vpop.f32.mrf.mxu0  ;;  %v465_v42 = vpop.f32.mrf.mxu1 }
  0x8c   :  { %v466_v43 = vadd.f32 %v465_v42, %v235_v39 }
  0x8e   :  { %v545_v44 = vmul.f32 0.5, %v466_v43 }
  0x90   :  { %1078 = vtanh.f32 %v545_v44 }
  0x91   :  { %v1314_v45 = vpop.f32.mrf.mxu2  ;;  %v282_v46 = vpop.f32.mrf.mxu3 }
  0x93   :  { %v240_v47 = vpop.f32.mrf.mxu0  ;;  %v467_v48 = vpop.f32.mrf.mxu1 }
  0x94   :  { %v468_v49 = vadd.f32 %v467_v48, %v237_v41 }
  0x96   :  { %v1079_v50 = vpop.eup %1078  ;;  %v546_v51 = vmul.f32 0.5, %v468_v49 }
  0x97   :  { %v609_v52 = vmul.f32 0.5, %v1079_v50 }
  0x98   :  { %1080 = vtanh.f32 %v546_v51 }
  0x99   :  { %v1321_v54 = vpop.f32.mrf.mxu2  ;;  %v641_v55 = vadd.f32 0.5, %v609_v52  ;;  %v285_v56 = vpop.f32.mrf.mxu3 }
  0x9b   :  { %v242_v57 = vpop.f32.mrf.mxu0  ;;  %v470_v58 = vpop.f32.mrf.mxu1  ;;  %v677_v59 = vmul.f32 %v1319_v53, %v641_v55 }
  0x9c   :  { %v471_v60 = vadd.f32 %v470_v58, %v240_v47 }
  0x9d   :  { %v710_v61 = vsel %vm709_vm3, %v677_v59, 0.0 }
  0x9e   :  { %v1081_v62 = vpop.eup %1080  ;;  %v547_v63 = vmul.f32 0.5, %v471_v60  ;;  %711 = vadd.xlane.f32.xlu0 %v710_v61 }
  0x9f   :  { %v610_v0 = vmul.f32 0.5, %v1081_v62 }
  0xa0   :  { %1082 = vtanh.f32 %v547_v63 }
  0xa1   :  { %v642_v1 = vadd.f32 0.5, %v610_v0  ;;  %v510_v2 = vpop.f32.mrf.mxu2  ;;  %v287_v9 = vpop.f32.mrf.mxu3 }
  0xa2   :  { %v511_v3 = vadd.f32 %v510_v2, %v280_v40 }
  0xa3   :  { %v245_v4 = vpop.f32.mrf.mxu0  ;;  %v472_v5 = vpop.f32.mrf.mxu1  ;;  %v678_v6 = vmul.f32 %v1319_v53, %v642_v1 }
  0xa4   :  { %v563_v7 = vmul.f32 0.5, %v511_v3  ;;  %v473_v8 = vadd.f32 %v472_v5, %v242_v57 }
  0xa5   :  { %v713_v10 = vsel %vm709_vm3, %v678_v6, 0.0 }
  0xa6   :  { %v1083_v11 = vpop.eup %1082  ;;  %1084 = vtanh.f32 %v563_v7  ;;  %v548_v12 = vmul.f32 0.5, %v473_v8  ;;  %714 = vadd.xlane.f32.xlu0 %v713_v10 }
  0xa7   :  { %v611_v13 = vmul.f32 0.5, %v1083_v11 }
  0xa8   :  { %1086 = vtanh.f32 %v548_v12 }
  0xa9   :  { %v512_v14 = vpop.f32.mrf.mxu2  ;;  %v643_v15 = vadd.f32 0.5, %v611_v13  ;;  %v290_v27 = vpop.f32.mrf.mxu3 }
  0xaa   :  { %v513_v16 = vadd.f32 %v512_v14, %v282_v46 }
  0xab   :  { %v247_v17 = vpop.f32.mrf.mxu0  ;;  %v475_v18 = vpop.f32.mrf.mxu1  ;;  %v679_v19 = vmul.f32 %v1319_v53, %v643_v15 }
  0xac   :  { %v1085_v20 = vpop.eup %1084  ;;  %v564_v21 = vmul.f32 0.5, %v513_v16  ;;  %v476_v22 = vadd.f32 %v475_v18, %v245_v4 }
  0xad   :  { %v627_v23 = vmul.f32 0.5, %v1085_v20  ;;  %v716_v24 = vsel %vm709_vm3, %v679_v19, 0.0 }
  0xae   :  { %v1087_v25 = vpop.eup %1086  ;;  %1088 = vtanh.f32 %v564_v21  ;;  %v549_v26 = vmul.f32 0.5, %v476_v22  ;;  %717 = vadd.xlane.f32.xlu1 %v716_v24 }
  0xaf   :  { %v659_v28 = vadd.f32 0.5, %v627_v23  ;;  %v612_v29 = vmul.f32 0.5, %v1087_v25 }
  0xb0   :  { %1090 = vtanh.f32 %v549_v26 }
  0xb1   :  { %v644_v30 = vadd.f32 0.5, %v612_v29  ;;  %v515_v31 = vpop.f32.mrf.mxu2  ;;  %v695_v32 = vmul.f32 %v1319_v53, %v659_v28  ;;  %v292_v48 = vpop.f32.mrf.mxu3 }
  0xb2   :  { %v516_v33 = vadd.f32 %v515_v31, %v285_v56 }
  0xb3   :  { %v250_v34 = vpop.f32.mrf.mxu0  ;;  %v477_v35 = vpop.f32.mrf.mxu1  ;;  %v680_v36 = vmul.f32 %v1319_v53, %v644_v30  ;;  %v764_v37 = vsel %vm709_vm3, %v695_v32, 0.0 }
  0xb4   :  { %v1089_v38 = vpop.eup %1088  ;;  %v565_v39 = vmul.f32 0.5, %v516_v33  ;;  %v478_v40 = vadd.f32 %v477_v35, %v247_v17  ;;  %765 = vadd.xlane.f32.xlu0 %v764_v37 }
  0xb5   :  { %v628_v41 = vmul.f32 0.5, %v1089_v38  ;;  %v719_v42 = vsel %vm709_vm3, %v680_v36, 0.0 }
  0xb6   :  { %v1091_v43 = vpop.eup %1090  ;;  %1092 = vtanh.f32 %v565_v39  ;;  %v550_v44 = vmul.f32 0.5, %v478_v40  ;;  %720 = vadd.xlane.f32.xlu1 %v719_v42 }
  0xb7   :  { %v660_v46 = vadd.f32 0.5, %v628_v41  ;;  %v613_v47 = vmul.f32 0.5, %v1091_v43 }
  0xb8   :  { %1094 = vtanh.f32 %v550_v44 }
  0xb9   :  { %v517_v49 = vpop.f32.mrf.mxu2  ;;  %v645_v50 = vadd.f32 0.5, %v613_v47  ;;  %v696_v51 = vmul.f32 %v1319_v53, %v660_v46  ;;  %v295_v7 = vpop.f32.mrf.mxu3 }
  0xba   :  { %v518_v52 = vadd.f32 %v517_v49, %v287_v9 }
  0xbb   :  { %v252_v55 = vpop.f32.mrf.mxu0  ;;  %v480_v56 = vpop.f32.mrf.mxu1  ;;  %v681_v57 = vmul.f32 %v1319_v53, %v645_v50  ;;  %v767_v58 = vsel %vm709_vm3, %v696_v51, 0.0 }
  0xbc   :  { %v1093_v59 = vpop.eup %1092  ;;  %v566_v60 = vmul.f32 0.5, %v518_v52  ;;  %v481_v61 = vadd.f32 %v480_v56, %v250_v34 }
  0xbd   :  { %v629_v62 = vmul.f32 0.5, %v1093_v59  ;;  %v722_v63 = vsel %vm709_vm3, %v681_v57, 0.0 }
  0xbe   :  { %v1095_v0 = vpop.eup %1094  ;;  %1096 = vtanh.f32 %v566_v60  ;;  %v551_v1 = vmul.f32 0.5, %v481_v61  ;;  %723 = vadd.xlane.f32.xlu2 %v722_v63  ;;  %768 = vadd.xlane.f32.xlu1 %v767_v58 }
  0xbf   :  { %v661_v2 = vadd.f32 0.5, %v629_v62  ;;  %v614_v3 = vmul.f32 0.5, %v1095_v0 }
  0xc0   :  { %1098 = vtanh.f32 %v551_v1 }
  0xc1   :  { %v520_v4 = vpop.f32.mrf.mxu2  ;;  %v697_v5 = vmul.f32 %v1319_v53, %v661_v2  ;;  %v646_v14 = vadd.f32 0.5, %v614_v3  ;;  %v297_v31 = vpop.f32.mrf.mxu3 }
  0xc2   :  { %v521_v6 = vadd.f32 %v520_v4, %v290_v27 }
  0xc3   :  { %v255_v8 = vpop.f32.mrf.mxu0  ;;  %v482_v9 = vpop.f32.mrf.mxu1  ;;  %v770_v10 = vsel %vm709_vm3, %v697_v5, 0.0  ;;  %v682_v22 = vmul.f32 %v1319_v53, %v646_v14 }
  0xc4   :  { %v1097_v11 = vpop.eup %1096  ;;  %v567_v12 = vmul.f32 0.5, %v521_v6  ;;  %v483_v13 = vadd.f32 %v482_v9, %v252_v55 }
  0xc5   :  { %v630_v15 = vmul.f32 0.5, %v1097_v11  ;;  %v725_v33 = vsel %vm709_vm3, %v682_v22, 0.0 }
  0xc6   :  { %v1099_v16 = vpop.eup %1098  ;;  %1100 = vtanh.f32 %v567_v12  ;;  %v552_v17 = vmul.f32 0.5, %v483_v13  ;;  %771 = vadd.xlane.f32.xlu2 %v770_v10 }
  0xc7   :  { %v662_v18 = vadd.f32 0.5, %v630_v15  ;;  %v615_v19 = vmul.f32 0.5, %v1099_v16 }
  0xc8   :  { %1102 = vtanh.f32 %v552_v17 }
  0xc9   :  { %v522_v20 = vpop.f32.mrf.mxu2  ;;  %v698_v21 = vmul.f32 %v1319_v53, %v662_v18  ;;  %v647_v24 = vadd.f32 0.5, %v615_v19  ;;  %v300_v56 = vpop.f32.mrf.mxu3 }
  0xca   :  { %v523_v23 = vadd.f32 %v522_v20, %v292_v48 }
  0xcb   :  { %v257_v25 = vpop.f32.mrf.mxu0  ;;  %v485_v26 = vpop.f32.mrf.mxu1  ;;  %v773_v27 = vsel %vm709_vm3, %v698_v21, 0.0  ;;  %v683_v38 = vmul.f32 %v1319_v53, %v647_v24 }
  0xcc   :  { %v1101_v28 = vpop.eup %1100  ;;  %v568_v29 = vmul.f32 0.5, %v523_v23  ;;  %v486_v30 = vadd.f32 %v485_v26, %v255_v8  ;;  %774 = vadd.xlane.f32.xlu0 %v773_v27 }
  0xcd   :  { %v631_v32 = vmul.f32 0.5, %v1101_v28  ;;  %v728_v47 = vsel %vm709_vm3, %v683_v38, 0.0 }
  0xce   :  { %v1103_v34 = vpop.eup %1102  ;;  %1104 = vtanh.f32 %v568_v29  ;;  %v553_v35 = vmul.f32 0.5, %v486_v30  ;;  %726 = vadd.xlane.f32.xlu2 %v725_v33 }
  0xcf   :  { %v663_v36 = vadd.f32 0.5, %v631_v32  ;;  %v616_v37 = vmul.f32 0.5, %v1103_v34 }
  0xd0   :  { %1106 = vtanh.f32 %v553_v35 }
  0xd1   :  { %v525_v39 = vpop.f32.mrf.mxu2  ;;  %v699_v40 = vmul.f32 %v1319_v53, %v663_v36  ;;  %v648_v42 = vadd.f32 0.5, %v616_v37  ;;  %v302_v13 = vpop.f32.mrf.mxu3 }
  0xd2   :  { %v526_v41 = vadd.f32 %v525_v39, %v295_v7 }
  0xd3   :  { %v260_v43 = vpop.f32.mrf.mxu0  ;;  %v487_v44 = vpop.f32.mrf.mxu1  ;;  %v776_v46 = vsel %vm709_vm3, %v699_v40, 0.0  ;;  %v684_v59 = vmul.f32 %v1319_v53, %v648_v42 }
  0xd4   :  { %v1105_v48 = vpop.eup %1104  ;;  %v569_v49 = vmul.f32 0.5, %v526_v41  ;;  %v488_v50 = vadd.f32 %v487_v44, %v257_v25  ;;  %777 = vadd.xlane.f32.xlu1 %v776_v46  ;;  %729 = vadd.xlane.f32.xlu0 %v728_v47 }
  0xd5   :  { %v632_v51 = vmul.f32 0.5, %v1105_v48  ;;  %v731_v3 = vsel %vm709_vm3, %v684_v59, 0.0 }
  0xd6   :  { %v1107_v52 = vpop.eup %1106  ;;  %1108 = vtanh.f32 %v569_v49  ;;  %v554_v55 = vmul.f32 0.5, %v488_v50 }
  0xd7   :  { %v664_v57 = vadd.f32 0.5, %v632_v51  ;;  %v617_v58 = vmul.f32 0.5, %v1107_v52 }
  0xd8   :  { %1110 = vtanh.f32 %v554_v55 }
  0xd9   :  { %v527_v60 = vpop.f32.mrf.mxu2  ;;  %v700_v61 = vmul.f32 %v1319_v53, %v664_v57  ;;  %v649_v63 = vadd.f32 0.5, %v617_v58  ;;  %v305_v34 = vpop.f32.mrf.mxu3 }
  0xda   :  { %v528_v62 = vadd.f32 %v527_v60, %v297_v31 }
  0xdb   :  { %v262_v0 = vpop.f32.mrf.mxu0  ;;  %v490_v1 = vpop.f32.mrf.mxu1  ;;  %v779_v2 = vsel %vm709_vm3, %v700_v61, 0.0  ;;  %v685_v12 = vmul.f32 %v1319_v53, %v649_v63 }
  0xdc   :  { %v1109_v4 = vpop.eup %1108  ;;  %v570_v5 = vmul.f32 0.5, %v528_v62  ;;  %v491_v6 = vadd.f32 %v490_v1, %v260_v43  ;;  %780 = vadd.xlane.f32.xlu2 %v779_v2  ;;  %732 = vadd.xlane.f32.xlu1 %v731_v3 }
  0xdd   :  { %v633_v7 = vmul.f32 0.5, %v1109_v4  ;;  %v734_v20 = vsel %vm709_vm3, %v685_v12, 0.0 }
  0xde   :  { %v1111_v8 = vpop.eup %1110  ;;  %1112 = vtanh.f32 %v570_v5  ;;  %v555_v9 = vmul.f32 0.5, %v491_v6 }
  0xdf   :  { %v665_v10 = vadd.f32 0.5, %v633_v7  ;;  %v618_v11 = vmul.f32 0.5, %v1111_v8 }
  0xe0   :  { %1114 = vtanh.f32 %v555_v9 }
  0xe1   :  { %v530_v14 = vpop.f32.mrf.mxu2  ;;  %v701_v15 = vmul.f32 %v1319_v53, %v665_v10  ;;  %v650_v17 = vadd.f32 0.5, %v618_v11  ;;  %v307_v55 = vpop.f32.mrf.mxu3 }
  0xe2   :  { %v531_v16 = vadd.f32 %v530_v14, %v300_v56 }
  0xe3   :  { %v265_v18 = vpop.f32.mrf.mxu0  ;;  %v492_v19 = vpop.f32.mrf.mxu1  ;;  %v782_v21 = vsel %vm709_vm3, %v701_v15, 0.0  ;;  %v686_v30 = vmul.f32 %v1319_v53, %v650_v17 }
  0xe4   :  { %v1113_v22 = vpop.eup %1112  ;;  %v571_v23 = vmul.f32 0.5, %v531_v16  ;;  %v493_v24 = vadd.f32 %v492_v19, %v262_v0  ;;  %735 = vadd.xlane.f32.xlu2 %v734_v20  ;;  %783 = vadd.xlane.f32.xlu0 %v782_v21 }
  0xe5   :  { %v634_v25 = vmul.f32 0.5, %v1113_v22  ;;  %v737_v39 = vsel %vm709_vm3, %v686_v30, 0.0 }
  0xe6   :  { %v1115_v26 = vpop.eup %1114  ;;  %1116 = vtanh.f32 %v571_v23  ;;  %v556_v27 = vmul.f32 0.5, %v493_v24 }
  0xe7   :  { %v666_v28 = vadd.f32 0.5, %v634_v25  ;;  %v619_v29 = vmul.f32 0.5, %v1115_v26 }
  0xe8   :  { %1118 = vtanh.f32 %v556_v27 }
  0xe9   :  { %v532_v31 = vpop.f32.mrf.mxu2  ;;  %v702_v32 = vmul.f32 %v1319_v53, %v666_v28  ;;  %v651_v35 = vadd.f32 0.5, %v619_v29  ;;  %v310_v16 = vpop.f32.mrf.mxu3 }
  0xea   :  { %v533_v33 = vadd.f32 %v532_v31, %v302_v13 }
  0xeb   :  { %v267_v36 = vpop.f32.mrf.mxu0  ;;  %v495_v37 = vpop.f32.mrf.mxu1  ;;  %v785_v38 = vsel %vm709_vm3, %v702_v32, 0.0  ;;  %v687_v49 = vmul.f32 %v1319_v53, %v651_v35 }
  0xec   :  { %v1117_v40 = vpop.eup %1116  ;;  %v572_v41 = vmul.f32 0.5, %v533_v33  ;;  %v496_v42 = vadd.f32 %v495_v37, %v265_v18  ;;  %786 = vadd.xlane.f32.xlu1 %v785_v38  ;;  %738 = vadd.xlane.f32.xlu0 %v737_v39 }
  0xed   :  { %v635_v43 = vmul.f32 0.5, %v1117_v40  ;;  %v740_v60 = vsel %vm709_vm3, %v687_v49, 0.0 }
  0xee   :  { %v1119_v44 = vpop.eup %1118  ;;  %1120 = vtanh.f32 %v572_v41  ;;  %v557_v46 = vmul.f32 0.5, %v496_v42 }
  0xef   :  { %v667_v47 = vadd.f32 0.5, %v635_v43  ;;  %v620_v48 = vmul.f32 0.5, %v1119_v44 }
  0xf0   :  { %1122 = vtanh.f32 %v557_v46 }
  0xf1   :  { %v535_v50 = vpop.f32.mrf.mxu2  ;;  %v703_v51 = vmul.f32 %v1319_v53, %v667_v47  ;;  %v652_v56 = vadd.f32 0.5, %v620_v48  ;;  %v312_v38 = vpop.f32.mrf.mxu3 }
  0xf2   :  { %v536_v52 = vadd.f32 %v535_v50, %v305_v34 }
  0xf3   :  { %v270_v57 = vpop.f32.mrf.mxu0  ;;  %v497_v58 = vpop.f32.mrf.mxu1  ;;  %v788_v59 = vsel %vm709_vm3, %v703_v51, 0.0  ;;  %v688_v5 = vmul.f32 %v1319_v53, %v652_v56 }
  0xf4   :  { %v1121_v61 = vpop.eup %1120  ;;  %v573_v62 = vmul.f32 0.5, %v536_v52  ;;  %v498_v63 = vadd.f32 %v497_v58, %v267_v36  ;;  %789 = vadd.xlane.f32.xlu2 %v788_v59  ;;  %741 = vadd.xlane.f32.xlu1 %v740_v60 }
  0xf5   :  { %v636_v0 = vmul.f32 0.5, %v1121_v61  ;;  %v743_v11 = vsel %vm709_vm3, %v688_v5, 0.0 }
  0xf6   :  { %v1123_v1 = vpop.eup %1122  ;;  %1124 = vtanh.f32 %v573_v62  ;;  %v558_v2 = vmul.f32 0.5, %v498_v63 }
  0xf7   :  { %v668_v3 = vadd.f32 0.5, %v636_v0  ;;  %v621_v4 = vmul.f32 0.5, %v1123_v1 }
  0xf8   :  { %1126 = vtanh.f32 %v558_v2 }
  0xf9   :  { %v537_v6 = vpop.f32.mrf.mxu2  ;;  %v704_v7 = vmul.f32 %v1319_v53, %v668_v3  ;;  %v653_v8 = vadd.f32 0.5, %v621_v4 }
  0xfa   :  { %v538_v37 = vadd.f32 %v537_v6, %v307_v55 }
  0xfb   :  { %v272_v9 = vpop.f32.mrf.mxu0  ;;  %v500_v10 = vpop.f32.mrf.mxu1  ;;  %v791_v12 = vsel %vm709_vm3, %v704_v7, 0.0  ;;  %v689_v21 = vmul.f32 %v1319_v53, %v653_v8 }
  0xfc   :  { %v1125_v13 = vpop.eup %1124  ;;  %v501_v14 = vadd.f32 %v500_v10, %v270_v57  ;;  %744 = vadd.xlane.f32.xlu2 %v743_v11  ;;  %792 = vadd.xlane.f32.xlu0 %v791_v12  ;;  %v574_v43 = vmul.f32 0.5, %v538_v37  ;;  %v1380_v57 = vstv %s1559_s5 }
  0xfd   :  { %v637_v15 = vmul.f32 0.5, %v1125_v13  ;;  %v746_v29 = vsel %vm709_vm3, %v689_v21, 0.0 }
  0xfe   :  { %v1127_v17 = vpop.eup %1126  ;;  %v559_v18 = vmul.f32 0.5, %v501_v14 }
  0xff   :  { %v669_v19 = vadd.f32 0.5, %v637_v15  ;;  %v622_v20 = vmul.f32 0.5, %v1127_v17 }
 0x100   :  { %1128 = vtanh.f32 %v559_v18 }
 0x101   :  { %v540_v22 = vpop.f32.mrf.mxu2  ;;  %v705_v23 = vmul.f32 %v1319_v53, %v669_v19  ;;  %v654_v25 = vadd.f32 0.5, %v622_v20 }
 0x102   :  { %v541_v24 = vadd.f32 %v540_v22, %v310_v16 }
 0x103   :  { %v275_v26 = vpop.f32.mrf.mxu0  ;;  %v502_v27 = vpop.f32.mrf.mxu1  ;;  %v794_v28 = vsel %vm709_vm3, %v705_v23, 0.0  ;;  %v690_v39 = vmul.f32 %v1319_v53, %v654_v25 }
 0x104   :  { %v506_v30 = vadd.f32 %v1314_v45, %v275_v26  ;;  %v503_v31 = vadd.f32 %v502_v27, %v272_v9  ;;  %v575_v32 = vmul.f32 0.5, %v541_v24  ;;  %795 = vadd.xlane.f32.xlu1 %v794_v28  ;;  %747 = vadd.xlane.f32.xlu0 %v746_v29 }
 0x105   :  { %v749_v44 = vsel %vm709_vm3, %v690_v39, 0.0 }
 0x106   :  { %v1129_v33 = vpop.eup %1128  ;;  %v561_v34 = vmul.f32 0.5, %v506_v30  ;;  %v560_v35 = vmul.f32 0.5, %v503_v31  ;;  %1130 = vtanh.f32 %v575_v32 }
 0x107   :  { %v623_v36 = vmul.f32 0.5, %v1129_v33 }
 0x108   :  { %1132 = vtanh.f32 %v561_v34 }
 0x109   :  { %v655_v40 = vadd.f32 0.5, %v623_v36  ;;  %1134 = vtanh.f32 %v560_v35  ;;  %v542_v41 = vpop.f32.mrf.mxu2 }
 0x10a   :  { %v543_v42 = vadd.f32 %v542_v41, %v312_v38 }
 0x10b   :  { %v277_v45 = vpop.f32.mrf.mxu0  ;;  %v691_v46 = vmul.f32 %v1319_v53, %v655_v40 }
 0x10c   :  { %v508_v47 = vadd.f32 %v1321_v54, %v277_v45  ;;  %v576_v48 = vmul.f32 0.5, %v543_v42  ;;  %750 = vadd.xlane.f32.xlu1 %v749_v44  ;;  %v1131_v49 = vpop.eup %1130 }
 0x10d   :  { %v752_v50 = vsel %vm709_vm3, %v691_v46, 0.0  ;;  %v639_v59 = vmul.f32 0.5, %v1131_v49 }
 0x10e   :  { %v1133_v51 = vpop.eup %1132  ;;  %v562_v52 = vmul.f32 0.5, %v508_v47  ;;  %1136 = vtanh.f32 %v576_v48  ;;  %753 = vadd.xlane.f32.xlu2 %v752_v50 }
 0x10f   :  { %v1135_v55 = vpop.eup %1134  ;;  %1138 = vtanh.f32 %v574_v43  ;;  %v625_v56 = vmul.f32 0.5, %v1133_v51  ;;  %v671_v1 = vadd.f32 0.5, %v639_v59 }
 0x110   :  { %v624_v58 = vmul.f32 0.5, %v1135_v55  ;;  %1140 = vtanh.f32 %v562_v52 }
 0x111   :  { %v657_v54 = vadd.f32 0.5, %v625_v56  ;;  %v712_v60 = vpop.xlane.xlu0 %711  ;;  %v707_v10 = vmul.f32 %v1319_v53, %v671_v1 }
 0x112   :  { %v656_v61 = vadd.f32 0.5, %v624_v58  ;;  %v808_v62 = vadd.f32 %v1380_v57, %v712_v60 }
 0x113   :  { %v693_v63 = vmul.f32 %v1319_v53, %v657_v54  ;;  %v800_v18 = vsel %vm709_vm3, %v707_v10, 0.0 }
 0x114   :  { %v1137_v0 = vpop.eup %1136  ;;  %841 = vst.msk [vmem:[%s1560_s6] sm:$0xff] %vm840_vm4, %v808_v62  ;;  %v692_v2 = vmul.f32 %v1319_v53, %v656_v61 }
 0x115   :  { %v1139_v3 = vpop.eup %1138  ;;  %v640_v4 = vmul.f32 0.5, %v1137_v0  ;;  %v758_v5 = vsel %vm709_vm3, %v693_v63, 0.0 }
 0x116   :  { %v1141_v6 = vpop.eup %1140  ;;  %759 = vadd.xlane.f32.xlu1 %v758_v5  ;;  %v755_v7 = vsel %vm709_vm3, %v692_v2, 0.0  ;;  %v638_v11 = vmul.f32 0.5, %v1139_v3 }
 0x117   :  { %v626_v8 = vmul.f32 0.5, %v1141_v6  ;;  %v672_v9 = vadd.f32 0.5, %v640_v4  ;;  %756 = vadd.xlane.f32.xlu0 %v755_v7 }
 0x118   :  { %v670_v19 = vadd.f32 0.5, %v638_v11 }
 0x119   :  { %v658_v12 = vadd.f32 0.5, %v626_v8  ;;  %v715_v13 = vpop.xlane.xlu0 %714  ;;  %v708_v14 = vmul.f32 %v1319_v53, %v672_v9 }
 0x11a   :  { %v809_v15 = vadd.f32 %v1380_v57, %v715_v13  ;;  %v706_v22 = vmul.f32 %v1319_v53, %v670_v19 }
 0x11b   :  { %v694_v16 = vmul.f32 %v1319_v53, %v658_v12  ;;  %v803_v17 = vsel %vm709_vm3, %v708_v14, 0.0 }
 0x11c   :  { %842 = vst.msk [vmem:[%s1560_s6 + $0x8] sm:$0xff] %vm840_vm4, %v809_v15  ;;  %v797_v24 = vsel %vm709_vm3, %v706_v22, 0.0 }
 0x11d   :  { %v761_v20 = vsel %vm709_vm3, %v694_v16, 0.0 }
 0x11e   :  { %762 = vadd.xlane.f32.xlu2 %v761_v20  ;;  %804 = vadd.xlane.f32.xlu1 %v803_v17 }
 0x11f   :  { %801 = vadd.xlane.f32.xlu0 %v800_v18 }
 0x121   :  { %v718_v21 = vpop.xlane.xlu1 %717 }
 0x122   :  { %v810_v23 = vadd.f32 %v1380_v57, %v718_v21 }
 0x124   :  { %843 = vst.msk [vmem:[%s1560_s6 + $0x10] sm:$0xff] %vm840_vm4, %v810_v23 }
 0x126   :  { %798 = vadd.xlane.f32.xlu2 %v797_v24 }
 0x127   :  { %v766_v25 = vpop.xlane.xlu0 %765 }
 0x128   :  { %v826_v26 = vadd.f32 %v1380_v57, %v766_v25 }
 0x129   :  { %v721_v27 = vpop.xlane.xlu1 %720 }
 0x12a   :  { %v811_v28 = vadd.f32 %v1380_v57, %v721_v27  ;;  %859 = vst.msk [vmem:[%s1560_s6 + $0x90] sm:$0xff] %vm840_vm4, %v826_v26 }
 0x12c   :  { %844 = vst.msk [vmem:[%s1560_s6 + $0x18] sm:$0xff] %vm840_vm4, %v811_v28 }
 0x131   :  { %v724_v53 = vpop.xlane.xlu2 %723  ;;  %v769_v29 = vpop.xlane.xlu1 %768 }
 0x132   :  { %v812_v30 = vadd.f32 %v1380_v57, %v724_v53  ;;  %v827_v31 = vadd.f32 %v1380_v57, %v769_v29 }
 0x134   :  { %845 = vst.msk [vmem:[%s1560_s6 + $0x20] sm:$0xff] %vm840_vm4, %v812_v30 }
 0x135   :  { %860 = vst.msk [vmem:[%s1560_s6 + $0x98] sm:$0xff] %vm840_vm4, %v827_v31 }
 0x139   :  { %v772_v32 = vpop.xlane.xlu2 %771 }
 0x13a   :  { %v828_v33 = vadd.f32 %v1380_v57, %v772_v32 }
 0x13c   :  { %861 = vst.msk [vmem:[%s1560_s6 + $0xa0] sm:$0xff] %vm840_vm4, %v828_v33 }
 0x13f   :  { %v775_v34 = vpop.xlane.xlu0 %774 }
 0x140   :  { %v829_v35 = vadd.f32 %v1380_v57, %v775_v34 }
 0x141   :  { %v727_v36 = vpop.xlane.xlu2 %726 }
 0x142   :  { %862 = vst.msk [vmem:[%s1560_s6 + $0xa8] sm:$0xff] %vm840_vm4, %v829_v35  ;;  %v813_v37 = vadd.f32 %v1380_v57, %v727_v36 }
 0x144   :  { %846 = vst.msk [vmem:[%s1560_s6 + $0x28] sm:$0xff] %vm840_vm4, %v813_v37 }
 0x147   :  { %v778_v38 = vpop.xlane.xlu1 %777  ;;  %v730_v39 = vpop.xlane.xlu0 %729 }
 0x148   :  { %v830_v40 = vadd.f32 %v1380_v57, %v778_v38  ;;  %v814_v41 = vadd.f32 %v1380_v57, %v730_v39 }
 0x14a   :  { %863 = vst.msk [vmem:[%s1560_s6 + $0xb0] sm:$0xff] %vm840_vm4, %v830_v40 }
 0x14b   :  { %847 = vst.msk [vmem:[%s1560_s6 + $0x30] sm:$0xff] %vm840_vm4, %v814_v41 }
 0x14f   :  { %v781_v42 = vpop.xlane.xlu2 %780  ;;  %v733_v43 = vpop.xlane.xlu1 %732 }
 0x150   :  { %v831_v45 = vadd.f32 %v1380_v57, %v781_v42  ;;  %v815_v44 = vadd.f32 %v1380_v57, %v733_v43 }
 0x152   :  { %864 = vst.msk [vmem:[%s1560_s6 + $0xb8] sm:$0xff] %vm840_vm4, %v831_v45 }
 0x153   :  { %848 = vst.msk [vmem:[%s1560_s6 + $0x38] sm:$0xff] %vm840_vm4, %v815_v44 }
 0x157   :  { %v736_v46 = vpop.xlane.xlu2 %735  ;;  %v784_v47 = vpop.xlane.xlu0 %783 }
 0x158   :  { %v816_v48 = vadd.f32 %v1380_v57, %v736_v46  ;;  %v832_v49 = vadd.f32 %v1380_v57, %v784_v47 }
 0x15a   :  { %849 = vst.msk [vmem:[%s1560_s6 + $0x40] sm:$0xff] %vm840_vm4, %v816_v48 }
 0x15b   :  { %865 = vst.msk [vmem:[%s1560_s6 + $0xc0] sm:$0xff] %vm840_vm4, %v832_v49 }
 0x15f   :  { %v787_v50 = vpop.xlane.xlu1 %786  ;;  %v739_v51 = vpop.xlane.xlu0 %738 }
 0x160   :  { %v833_v52 = vadd.f32 %v1380_v57, %v787_v50  ;;  %v817_v55 = vadd.f32 %v1380_v57, %v739_v51 }
 0x162   :  { %866 = vst.msk [vmem:[%s1560_s6 + $0xc8] sm:$0xff] %vm840_vm4, %v833_v52 }
 0x163   :  { %850 = vst.msk [vmem:[%s1560_s6 + $0x48] sm:$0xff] %vm840_vm4, %v817_v55 }
 0x167   :  { %v790_v56 = vpop.xlane.xlu2 %789  ;;  %v742_v58 = vpop.xlane.xlu1 %741 }
 0x168   :  { %v834_v59 = vadd.f32 %v1380_v57, %v790_v56  ;;  %v818_v54 = vadd.f32 %v1380_v57, %v742_v58 }
 0x16a   :  { %867 = vst.msk [vmem:[%s1560_s6 + $0xd0] sm:$0xff] %vm840_vm4, %v834_v59 }
 0x16b   :  { %851 = vst.msk [vmem:[%s1560_s6 + $0x50] sm:$0xff] %vm840_vm4, %v818_v54 }
 0x16f   :  { %v745_v60 = vpop.xlane.xlu2 %744  ;;  %v793_v61 = vpop.xlane.xlu0 %792 }
 0x170   :  { %v819_v62 = vadd.f32 %v1380_v57, %v745_v60  ;;  %v835_v63 = vadd.f32 %v1380_v57, %v793_v61 }
 0x172   :  { %852 = vst.msk [vmem:[%s1560_s6 + $0x58] sm:$0xff] %vm840_vm4, %v819_v62 }
 0x173   :  { %868 = vst.msk [vmem:[%s1560_s6 + $0xd8] sm:$0xff] %vm840_vm4, %v835_v63 }
 0x177   :  { %v796_v0 = vpop.xlane.xlu1 %795  ;;  %v748_v1 = vpop.xlane.xlu0 %747 }
 0x178   :  { %v836_v2 = vadd.f32 %v1380_v57, %v796_v0  ;;  %v820_v3 = vadd.f32 %v1380_v57, %v748_v1 }
 0x17a   :  { %869 = vst.msk [vmem:[%s1560_s6 + $0xe0] sm:$0xff] %vm840_vm4, %v836_v2 }
 0x17b   :  { %853 = vst.msk [vmem:[%s1560_s6 + $0x60] sm:$0xff] %vm840_vm4, %v820_v3 }
 0x17f   :  { %v751_v4 = vpop.xlane.xlu1 %750 }
 0x180   :  { %v821_v5 = vadd.f32 %v1380_v57, %v751_v4 }
 0x181   :  { %v754_v6 = vpop.xlane.xlu2 %753 }
 0x182   :  { %854 = vst.msk [vmem:[%s1560_s6 + $0x68] sm:$0xff] %vm840_vm4, %v821_v5  ;;  %v822_v7 = vadd.f32 %v1380_v57, %v754_v6 }
 0x184   :  { %855 = vst.msk [vmem:[%s1560_s6 + $0x70] sm:$0xff] %vm840_vm4, %v822_v7 }
 0x189   :  { %v760_v8 = vpop.xlane.xlu1 %759 }
 0x18a   :  { %v824_v9 = vadd.f32 %v1380_v57, %v760_v8  ;;  %v757_v10 = vpop.xlane.xlu0 %756 }
 0x18b   :  { %v823_v11 = vadd.f32 %v1380_v57, %v757_v10 }
 0x18c   :  { %857 = vst.msk [vmem:[%s1560_s6 + $0x80] sm:$0xff] %vm840_vm4, %v824_v9 }
 0x18d   :  { %856 = vst.msk [vmem:[%s1560_s6 + $0x78] sm:$0xff] %vm840_vm4, %v823_v11 }
 0x191   :  { %v763_v12 = vpop.xlane.xlu2 %762  ;;  %v805_v13 = vpop.xlane.xlu1 %804 }
 0x192   :  { %v825_v14 = vadd.f32 %v1380_v57, %v763_v12  ;;  %v839_v15 = vadd.f32 %v1380_v57, %v805_v13  ;;  %v802_v16 = vpop.xlane.xlu0 %801 }
 0x193   :  { %v838_v17 = vadd.f32 %v1380_v57, %v802_v16 }
 0x194   :  { %858 = vst.msk [vmem:[%s1560_s6 + $0x88] sm:$0xff] %vm840_vm4, %v825_v14 }
 0x195   :  { %872 = vst.msk [vmem:[%s1560_s6 + $0xf8] sm:$0xff] %vm840_vm4, %v839_v15 }
 0x196   :  { %871 = vst.msk [vmem:[%s1560_s6 + $0xf0] sm:$0xff] %vm840_vm4, %v838_v17 }
 0x199   :  { %v799_v18 = vpop.xlane.xlu2 %798 }
 0x19a   :  { %v837_v19 = vadd.f32 %v1380_v57, %v799_v18 }
 0x19c   :  { %870 = vst.msk [vmem:[%s1560_s6 + $0xe8] sm:$0xff] %vm840_vm4, %v837_v19 }

</bundles_post_ra>
